<compile_context>
chip_gen: v6e
topology: v6e:2x2x1
jax: 0.10.0
libtpu: 0.0.40
codegen_flags: <defaults>
</compile_context>

<pallas_src>
import functools

import jax
import jax.numpy as jnp
from jax.experimental import pallas as pl
from jax.experimental.pallas import tpu as pltpu


def _mstff3_kernel(x1_ref, x2_ref, x3_ref, x4_ref,
                   wf_ref, bf_ref, we2_ref, we3_ref, we4_ref, be_ref,
                   out_ref):
    """One (B_TILE, C, TILE_P) block of pixels (pixels on the lane axis)."""
    wf = wf_ref[...]            # (C2, C)  shared conv weight (BN folded), MXU dtype
    bf = bf_ref[...]            # (C2, 1)  f32 bias (BN folded)
    we2 = we2_ref[...]          # (3, C2)  evalue weight slices, MXU dtype
    we3 = we3_ref[...]
    we4 = we4_ref[...]
    be = be_ref[...]            # (3, 1)   f32
    mxu_dtype = wf.dtype

    b_tile = x1_ref.shape[0]
    for b in range(b_tile):     # static unroll; b_tile is kept <= 8
        x1 = x1_ref[b]          # (C, TP), io dtype (bf16 fed straight to the MXU)
        x2 = x2_ref[b]
        x3 = x3_ref[b]
        x4 = x4_ref[b]

        # Shared BasicConv (1x1 conv + folded BN + ReLU) on x2/x3/x4:
        # three separate MXU matmuls, no lane concat / re-slice.
        a2 = jnp.maximum(jnp.dot(wf, x2, preferred_element_type=jnp.float32) + bf, 0.0)
        a3 = jnp.maximum(jnp.dot(wf, x3, preferred_element_type=jnp.float32) + bf, 0.0)
        a4 = jnp.maximum(jnp.dot(wf, x4, preferred_element_type=jnp.float32) + bf, 0.0)

        # evalue 1x1 conv on cat([a2, a3, a4], channel): 3 logits per pixel,
        # produced lane-dense as (3, TP) in f32.
        logits = (jnp.dot(we2, a2.astype(mxu_dtype), preferred_element_type=jnp.float32)
                  + jnp.dot(we3, a3.astype(mxu_dtype), preferred_element_type=jnp.float32)
                  + jnp.dot(we4, a4.astype(mxu_dtype), preferred_element_type=jnp.float32)
                  + be)

        # 3-way softmax: purely elementwise VPU/EUP work, no cross-lane reductions.
        l2 = logits[0:1, :]
        l3 = logits[1:2, :]
        l4 = logits[2:3, :]
        m = jnp.maximum(jnp.maximum(l2, l3), l4)
        e2 = jnp.exp(l2 - m)
        e3 = jnp.exp(l3 - m)
        e4 = jnp.exp(l4 - m)
        s = e2 + e3 + e4
        inv = pl.reciprocal(s, approx=True)
        inv = inv * (2.0 - s * inv)       # one Newton step -> ~f32 accuracy
        w2 = e2 * inv
        w3 = e3 * inv
        w4 = e4 * inv

        out = x2 * w2 + x3 * w3 + x4 * w4 + x1        # promoted to f32, (C, TP)
        out_ref[b] = out.astype(out_ref.dtype)


def _round_up(x, m):
    return (x + m - 1) // m * m


def _vmem_capacity_bytes():
    try:
        return int(pltpu.get_tpu_info().vmem_capacity_bytes)
    except Exception:
        return 64 << 20        # conservative fallback: v7x per-TensorCore VMEM


def _vmem_estimate(b_tile, c, c2, tile_p, itemsize):
    """Conservative per-step VMEM estimate with sublane padding + f32 temps."""
    packing = max(1, 4 // itemsize)              # values per 32-bit sublane word
    c_io = _round_up(c, 8 * packing)             # io-dtype channel rows, padded
    c_f32 = _round_up(c, 8)
    c2_f32 = _round_up(c2, 8)
    # 4 inputs + 1 output, double-buffered BlockSpec windows.
    io = 5 * 2 * b_tile * c_io * tile_p * itemsize
    # Live f32 temporaries per unrolled batch iteration (a2/a3/a4, residual
    # accumulation, softmax rows).
    tmp = (3 * c2_f32 + 4 * c_f32 + 4 * 8) * tile_p * 4
    # Resident weight operands (padded, double-buffered, f32 upper bound).
    wpad = (_round_up(c2, 8) * _round_up(c, 128)        # wf
            + _round_up(c2, 8) * 128                    # bf
            + 3 * 8 * _round_up(c2, 128)                # we2/we3/we4
            + 8 * 128)                                  # be
    return io + tmp + 2 * wpad * 4


def _pick_tiles(n, c, c2, hw, itemsize, budget, tile_p_max):
    """Pick (b_tile, tile_p): biggest lane tile that fits the VMEM budget,
    then fold batch images in until per-step HBM traffic is ~1-2 MiB, while
    always keeping >= 2 grid steps when the shape allows it (v7x megacore)."""
    if hw <= 128:
        tile_p = hw                               # full extent -> always legal
    else:
        tile_p = min(_round_up(tile_p_max, 128), (hw // 128) * 128)
        while tile_p > 128 and _vmem_estimate(1, c, c2, tile_p, itemsize) > budget:
            tile_p -= 128

    def steps(bt, tp):
        return pl.cdiv(n, bt) * pl.cdiv(hw, tp)

    target_io = 2 << 20
    b_tile = 1
    b_tile_max = min(n, 8)                        # bounds the static in-kernel unroll
    while (b_tile < b_tile_max
           and 5 * b_tile * c * tile_p * itemsize < target_io
           and _vmem_estimate(b_tile + 1, c, c2, tile_p, itemsize) <= budget
           and steps(b_tile + 1, tile_p) >= 2):
        b_tile += 1

    # Make sure both TensorCores get work whenever possible.
    while steps(b_tile, tile_p) < 2 and tile_p > 128:
        tile_p -= 128
    return b_tile, tile_p


@functools.partial(jax.jit, static_argnames=("tile_p_max",))
def mstff3_forward(x1, x2, x3, x4, params, tile_p_max=2048):
    """x1..x4: (N, C, H, W), f32 or bf16. Returns (N, C, H, W) in the input dtype."""
    n, c, h, w = x1.shape
    c2 = c // 2
    hw = h * w
    io_dtype = x1.dtype
    f32 = jnp.float32
    mxu_dtype = jnp.bfloat16 if io_dtype == jnp.bfloat16 else f32

    # ---- fold BN (eval mode) into the shared 1x1 conv ---------------------
    conv_w = params["conv_w"].astype(f32)      # (C2, C)
    conv_b = params["conv_b"].astype(f32)      # (C2,)
    gamma = params["bn_gamma"].astype(f32)
    beta = params["bn_beta"].astype(f32)
    rmean = params["bn_mean"].astype(f32)
    rvar = params["bn_var"].astype(f32)
    eps = 1e-5
    scale = gamma / jnp.sqrt(rvar + eps)                        # (C2,)
    wf = (conv_w * scale[:, None]).astype(mxu_dtype)            # (C2, C)
    bf = ((conv_b - rmean) * scale + beta)[:, None]             # (C2, 1) f32

    # ---- evalue 1x1 conv, split by the concat order [a2, a3, a4] ----------
    ev_w = params["evalue_w"].astype(f32)      # (3, 3*C2)
    ev_b = params["evalue_b"].astype(f32)      # (3,)
    we2 = ev_w[:, 0 * c2:1 * c2].astype(mxu_dtype)              # (3, C2)
    we3 = ev_w[:, 1 * c2:2 * c2].astype(mxu_dtype)
    we4 = ev_w[:, 2 * c2:3 * c2].astype(mxu_dtype)
    be = ev_b[:, None]                                          # (3, 1) f32

    # ---- view NCHW as (N, C, H*W): free reshape, no transpose, no pad -----
    v1 = x1.reshape(n, c, hw)
    v2 = x2.reshape(n, c, hw)
    v3 = x3.reshape(n, c, hw)
    v4 = x4.reshape(n, c, hw)

    # ---- per-generation VMEM sizing + tile selection -----------------------
    cap = _vmem_capacity_bytes()
    vmem_limit = min(int(cap * 0.8), 100 << 20)   # ~100 MiB on v5e/v6e, 64 MiB-safe on v7x
    budget = int(vmem_limit * 0.85)
    itemsize = jnp.dtype(io_dtype).itemsize
    b_tile, tile_p = _pick_tiles(n, c, c2, hw, itemsize, budget, tile_p_max)

    grid = (pl.cdiv(n, b_tile), pl.cdiv(hw, tile_p))   # partial blocks -> masked writes

    row_spec = pl.BlockSpec((b_tile, c, tile_p), lambda b, j: (b, 0, j))
    full = lambda shape: pl.BlockSpec(shape, lambda b, j: (0, 0))

    out_rows = pl.pallas_call(
        _mstff3_kernel,
        out_shape=jax.ShapeDtypeStruct((n, c, hw), io_dtype),
        grid_spec=pltpu.PrefetchScalarGridSpec(
            num_scalar_prefetch=0,
            grid=grid,
            in_specs=[row_spec, row_spec, row_spec, row_spec,
                      full((c2, c)), full((c2, 1)),
                      full((3, c2)), full((3, c2)), full((3, c2)),
                      full((3, 1))],
            out_specs=row_spec,
        ),
        compiler_params=pltpu.CompilerParams(
            dimension_semantics=("parallel", "parallel"),
            vmem_limit_bytes=int(vmem_limit)),
    )(v1, v2, v3, v4, wf, bf, we2, we3, we4, be)

    return out_rows.reshape(n, c, h, w)


def mstff3_reference(x1, x2, x3, x4, params):
    """Pure-JAX reference (same eval-mode BN folding), NCHW throughout."""
    eps = 1e-5
    scale = params["bn_gamma"] / jnp.sqrt(params["bn_var"] + eps)
    wf = params["conv_w"] * scale[:, None]                     # (C2, C)
    bf = (params["conv_b"] - params["bn_mean"]) * scale + params["bn_beta"]

    def shared(x):
        y = jnp.einsum("oc,nchw->nohw", wf, x) + bf[None, :, None, None]
        return jnp.maximum(y, 0.0)

    a2, a3, a4 = shared(x2), shared(x3), shared(x4)
    x_mix = jnp.concatenate([a2, a3, a4], axis=1)
    logits = (jnp.einsum("oc,nchw->nohw", params["evalue_w"], x_mix)
              + params["evalue_b"][None, :, None, None])
    wgt = jax.nn.softmax(logits, axis=1)
    return x2 * wgt[:, 0:1] + x3 * wgt[:, 1:2] + x4 * wgt[:, 2:3] + x1


def make_params(key, in_channels):
    c = in_channels
    c2 = c // 2
    ks = jax.random.split(key, 5)
    return {
        "conv_w": 0.3 * jax.random.normal(ks[0], (c2, c), jnp.float32),
        "conv_b": 0.1 * jax.random.normal(ks[1], (c2,), jnp.float32),
        "bn_gamma": jnp.ones((c2,), jnp.float32)
                    + 0.1 * jax.random.normal(ks[2], (c2,), jnp.float32),
        "bn_beta": 0.05 * jax.random.normal(ks[3], (c2,), jnp.float32),
        "bn_mean": jnp.zeros((c2,), jnp.float32),
        "bn_var": jnp.ones((c2,), jnp.float32),
        "evalue_w": 0.3 * jax.random.normal(ks[4], (3, 3 * c2), jnp.float32),
        "evalue_b": jnp.zeros((3,), jnp.float32),
    }


if __name__ == "__main__":
    key = jax.random.PRNGKey(0)
    k1, k2, k3, k4, kp, kq = jax.random.split(key, 6)

    # --- canonical small shape, f32 I/O --------------------------------------
    N, C, H, W = 2, 4, 16, 16
    x1 = jax.random.normal(k1, (N, C, H, W), jnp.float32)
    x2 = jax.random.normal(k2, (N, C, H, W), jnp.float32)
    x3 = jax.random.normal(k3, (N, C, H, W), jnp.float32)
    x4 = jax.random.normal(k4, (N, C, H, W), jnp.float32)
    params = make_params(kp, C)

    out = jax.block_until_ready(mstff3_forward(x1, x2, x3, x4, params))
    ref = mstff3_reference(x1, x2, x3, x4, params)
    assert out.shape == (N, C, H, W)
    assert out.dtype == x1.dtype
    assert jnp.allclose(out, ref, atol=1e-4, rtol=1e-4), "f32 mismatch vs reference"

    # --- bf16 I/O: bf16 operands fed straight to the MXU ---------------------
    xb = [x.astype(jnp.bfloat16) for x in (x1, x2, x3, x4)]
    out_bf = jax.block_until_ready(mstff3_forward(*xb, params))
    ref_bf = mstff3_reference(*(x.astype(jnp.float32) for x in xb), params)
    assert out_bf.dtype == jnp.bfloat16
    assert jnp.allclose(out_bf.astype(jnp.float32), ref_bf, atol=3e-2, rtol=3e-2), \
        "bf16 mismatch vs reference"

    # --- shape exercising batch-folded blocks + partial pixel/batch tiles ----
    N2, C2_, H2, W2 = 10, 8, 20, 20
    keys = jax.random.split(kq, 5)
    ys = [jax.random.normal(keys[i], (N2, C2_, H2, W2), jnp.float32) for i in range(4)]
    params2 = make_params(keys[4], C2_)
    out2 = jax.block_until_ready(mstff3_forward(*ys, params2))
    ref2 = mstff3_reference(*ys, params2)
    assert out2.shape == (N2, C2_, H2, W2)
    assert jnp.allclose(out2, ref2, atol=1e-4, rtol=1e-4), "batched mismatch vs reference"

    print("KERNEL_OK")
</pallas_src>

<mosaic_0001>
module attributes {stable_mosaic.version = 11 : i64} {
  func.func @_mstff3_kernel(%arg0: i32, %arg1: i32, %arg2: memref<1x4x256xf32, #tpu.memory_space<vmem>>, %arg3: memref<1x4x256xf32, #tpu.memory_space<vmem>>, %arg4: memref<1x4x256xf32, #tpu.memory_space<vmem>>, %arg5: memref<1x4x256xf32, #tpu.memory_space<vmem>>, %arg6: memref<2x4xf32, #tpu.memory_space<vmem>>, %arg7: memref<2x1xf32, #tpu.memory_space<vmem>>, %arg8: memref<3x2xf32, #tpu.memory_space<vmem>>, %arg9: memref<3x2xf32, #tpu.memory_space<vmem>>, %arg10: memref<3x2xf32, #tpu.memory_space<vmem>>, %arg11: memref<3x1xf32, #tpu.memory_space<vmem>>, %arg12: memref<1x4x256xf32, #tpu.memory_space<vmem>>) attributes {dimension_semantics = [#tpu.dimension_semantics<parallel>, #tpu.dimension_semantics<parallel>], iteration_bounds = array<i64: 2, 1>, scalar_prefetch = 0 : i64, scratch_operands = 0 : i64, tpu.core_type = #tpu.core_type<tc>, window_params = [{transform_indices = @transform_0, window_bounds = array<i64: 1, 4, 256>}, {transform_indices = @transform_1, window_bounds = array<i64: 1, 4, 256>}, {transform_indices = @transform_2, window_bounds = array<i64: 1, 4, 256>}, {transform_indices = @transform_3, window_bounds = array<i64: 1, 4, 256>}, {pipeline_mode = #tpu.pipeline_mode<synchronous>, transform_indices = @transform_4, window_bounds = array<i64: 2, 4>}, {pipeline_mode = #tpu.pipeline_mode<synchronous>, transform_indices = @transform_5, window_bounds = array<i64: 2, 1>}, {pipeline_mode = #tpu.pipeline_mode<synchronous>, transform_indices = @transform_6, window_bounds = array<i64: 3, 2>}, {pipeline_mode = #tpu.pipeline_mode<synchronous>, transform_indices = @transform_7, window_bounds = array<i64: 3, 2>}, {pipeline_mode = #tpu.pipeline_mode<synchronous>, transform_indices = @transform_8, window_bounds = array<i64: 3, 2>}, {pipeline_mode = #tpu.pipeline_mode<synchronous>, transform_indices = @transform_9, window_bounds = array<i64: 3, 1>}, {transform_indices = @transform_10, window_bounds = array<i64: 1, 4, 256>}]} {
    %c0 = arith.constant 0 : index
    %c0_0 = arith.constant 0 : index
    %0 = vector.load %arg6[%c0, %c0_0] : memref<2x4xf32, #tpu.memory_space<vmem>>, vector<2x4xf32>
    %c0_1 = arith.constant 0 : index
    %c0_2 = arith.constant 0 : index
    %1 = vector.load %arg7[%c0_1, %c0_2] : memref<2x1xf32, #tpu.memory_space<vmem>>, vector<2x1xf32>
    %c0_3 = arith.constant 0 : index
    %c0_4 = arith.constant 0 : index
    %2 = vector.load %arg8[%c0_3, %c0_4] : memref<3x2xf32, #tpu.memory_space<vmem>>, vector<3x2xf32>
    %c0_5 = arith.constant 0 : index
    %c0_6 = arith.constant 0 : index
    %3 = vector.load %arg9[%c0_5, %c0_6] : memref<3x2xf32, #tpu.memory_space<vmem>>, vector<3x2xf32>
    %c0_7 = arith.constant 0 : index
    %c0_8 = arith.constant 0 : index
    %4 = vector.load %arg10[%c0_7, %c0_8] : memref<3x2xf32, #tpu.memory_space<vmem>>, vector<3x2xf32>
    %c0_9 = arith.constant 0 : index
    %c0_10 = arith.constant 0 : index
    %5 = vector.load %arg11[%c0_9, %c0_10] : memref<3x1xf32, #tpu.memory_space<vmem>>, vector<3x1xf32>
    %c0_11 = arith.constant 0 : index
    %c0_12 = arith.constant 0 : index
    %c0_13 = arith.constant 0 : index
    %6 = vector.load %arg2[%c0_11, %c0_12, %c0_13] : memref<1x4x256xf32, #tpu.memory_space<vmem>>, vector<1x4x256xf32>
    %7 = vector.shape_cast %6 : vector<1x4x256xf32> to vector<4x256xf32>
    %c0_14 = arith.constant 0 : index
    %c0_15 = arith.constant 0 : index
    %c0_16 = arith.constant 0 : index
    %8 = vector.load %arg3[%c0_14, %c0_15, %c0_16] : memref<1x4x256xf32, #tpu.memory_space<vmem>>, vector<1x4x256xf32>
    %9 = vector.shape_cast %8 : vector<1x4x256xf32> to vector<4x256xf32>
    %c0_17 = arith.constant 0 : index
    %c0_18 = arith.constant 0 : index
    %c0_19 = arith.constant 0 : index
    %10 = vector.load %arg4[%c0_17, %c0_18, %c0_19] : memref<1x4x256xf32, #tpu.memory_space<vmem>>, vector<1x4x256xf32>
    %11 = vector.shape_cast %10 : vector<1x4x256xf32> to vector<4x256xf32>
    %c0_20 = arith.constant 0 : index
    %c0_21 = arith.constant 0 : index
    %c0_22 = arith.constant 0 : index
    %12 = vector.load %arg5[%c0_20, %c0_21, %c0_22] : memref<1x4x256xf32, #tpu.memory_space<vmem>>, vector<1x4x256xf32>
    %13 = vector.shape_cast %12 : vector<1x4x256xf32> to vector<4x256xf32>
    %cst = arith.constant dense<0.000000e+00> : vector<2x256xf32>
    %14 = tpu.matmul %0, %9, %cst {dimension_numbers = #tpu.dot_dimension_numbers<[1], [0], [0], [1], [0, 0, 1, 1], [], []>} : vector<2x4xf32>, vector<4x256xf32>, vector<2x256xf32> -> vector<2x256xf32>
    %15 = vector.broadcast %1 : vector<2x1xf32> to vector<2x256xf32>
    %16 = arith.addf %14, %15 : vector<2x256xf32>
    %cst_23 = arith.constant 0.000000e+00 : f32
    %17 = vector.broadcast %cst_23 : f32 to vector<2x256xf32>
    %18 = arith.maximumf %16, %17 : vector<2x256xf32>
    %cst_24 = arith.constant dense<0.000000e+00> : vector<2x256xf32>
    %19 = tpu.matmul %0, %11, %cst_24 {dimension_numbers = #tpu.dot_dimension_numbers<[1], [0], [0], [1], [0, 0, 1, 1], [], []>} : vector<2x4xf32>, vector<4x256xf32>, vector<2x256xf32> -> vector<2x256xf32>
    %20 = vector.broadcast %1 : vector<2x1xf32> to vector<2x256xf32>
    %21 = arith.addf %19, %20 : vector<2x256xf32>
    %cst_25 = arith.constant 0.000000e+00 : f32
    %22 = vector.broadcast %cst_25 : f32 to vector<2x256xf32>
    %23 = arith.maximumf %21, %22 : vector<2x256xf32>
    %cst_26 = arith.constant dense<0.000000e+00> : vector<2x256xf32>
    %24 = tpu.matmul %0, %13, %cst_26 {dimension_numbers = #tpu.dot_dimension_numbers<[1], [0], [0], [1], [0, 0, 1, 1], [], []>} : vector<2x4xf32>, vector<4x256xf32>, vector<2x256xf32> -> vector<2x256xf32>
    %25 = vector.broadcast %1 : vector<2x1xf32> to vector<2x256xf32>
    %26 = arith.addf %24, %25 : vector<2x256xf32>
    %cst_27 = arith.constant 0.000000e+00 : f32
    %27 = vector.broadcast %cst_27 : f32 to vector<2x256xf32>
    %28 = arith.maximumf %26, %27 : vector<2x256xf32>
    %cst_28 = arith.constant dense<0.000000e+00> : vector<3x256xf32>
    %29 = tpu.matmul %2, %18, %cst_28 {dimension_numbers = #tpu.dot_dimension_numbers<[1], [0], [0], [1], [0, 0, 1, 1], [], []>} : vector<3x2xf32>, vector<2x256xf32>, vector<3x256xf32> -> vector<3x256xf32>
    %cst_29 = arith.constant dense<0.000000e+00> : vector<3x256xf32>
    %30 = tpu.matmul %3, %23, %cst_29 {dimension_numbers = #tpu.dot_dimension_numbers<[1], [0], [0], [1], [0, 0, 1, 1], [], []>} : vector<3x2xf32>, vector<2x256xf32>, vector<3x256xf32> -> vector<3x256xf32>
    %31 = arith.addf %29, %30 : vector<3x256xf32>
    %cst_30 = arith.constant dense<0.000000e+00> : vector<3x256xf32>
    %32 = tpu.matmul %4, %28, %cst_30 {dimension_numbers = #tpu.dot_dimension_numbers<[1], [0], [0], [1], [0, 0, 1, 1], [], []>} : vector<3x2xf32>, vector<2x256xf32>, vector<3x256xf32> -> vector<3x256xf32>
    %33 = arith.addf %31, %32 : vector<3x256xf32>
    %34 = vector.broadcast %5 : vector<3x1xf32> to vector<3x256xf32>
    %35 = arith.addf %33, %34 : vector<3x256xf32>
    %36 = vector.extract_strided_slice %35 {offsets = [0, 0], sizes = [1, 256], strides = [1, 1]} : vector<3x256xf32> to vector<1x256xf32>
    %37 = vector.extract_strided_slice %35 {offsets = [1, 0], sizes = [1, 256], strides = [1, 1]} : vector<3x256xf32> to vector<1x256xf32>
    %38 = vector.extract_strided_slice %35 {offsets = [2, 0], sizes = [1, 256], strides = [1, 1]} : vector<3x256xf32> to vector<1x256xf32>
    %39 = arith.maximumf %36, %37 : vector<1x256xf32>
    %40 = arith.maximumf %39, %38 : vector<1x256xf32>
    %41 = arith.subf %36, %40 : vector<1x256xf32>
    %42 = math.exp %41 : vector<1x256xf32>
    %43 = arith.subf %37, %40 : vector<1x256xf32>
    %44 = math.exp %43 : vector<1x256xf32>
    %45 = arith.subf %38, %40 : vector<1x256xf32>
    %46 = math.exp %45 : vector<1x256xf32>
    %47 = arith.addf %42, %44 : vector<1x256xf32>
    %48 = arith.addf %47, %46 : vector<1x256xf32>
    %49 = tpu.reciprocal %48 {approx = true} : vector<1x256xf32> -> vector<1x256xf32>
    %50 = arith.mulf %48, %49 : vector<1x256xf32>
    %cst_31 = arith.constant 2.000000e+00 : f32
    %51 = vector.broadcast %cst_31 : f32 to vector<1x256xf32>
    %52 = arith.subf %51, %50 : vector<1x256xf32>
    %53 = arith.mulf %49, %52 : vector<1x256xf32>
    %54 = arith.mulf %42, %53 : vector<1x256xf32>
    %55 = arith.mulf %44, %53 : vector<1x256xf32>
    %56 = arith.mulf %46, %53 : vector<1x256xf32>
    %57 = vector.broadcast %54 : vector<1x256xf32> to vector<4x256xf32>
    %58 = arith.mulf %9, %57 : vector<4x256xf32>
    %59 = vector.broadcast %55 : vector<1x256xf32> to vector<4x256xf32>
    %60 = arith.mulf %11, %59 : vector<4x256xf32>
    %61 = arith.addf %58, %60 : vector<4x256xf32>
    %62 = vector.broadcast %56 : vector<1x256xf32> to vector<4x256xf32>
    %63 = arith.mulf %13, %62 : vector<4x256xf32>
    %64 = arith.addf %61, %63 : vector<4x256xf32>
    %65 = arith.addf %64, %7 : vector<4x256xf32>
    %c0_32 = arith.constant 0 : index
    %c0_33 = arith.constant 0 : index
    %c0_34 = arith.constant 0 : index
    %66 = vector.load %arg12[%c0_32, %c0_33, %c0_34] : memref<1x4x256xf32, #tpu.memory_space<vmem>>, vector<1x4x256xf32>
    %67 = vector.shape_cast %66 : vector<1x4x256xf32> to vector<4x256xf32>
    %68 = vector.shape_cast %65 : vector<4x256xf32> to vector<1x4x256xf32>
    tpu.vector_store %arg12[%c0_32, %c0_33, %c0_34], %68 {strides = array<i32>} : memref<1x4x256xf32, #tpu.memory_space<vmem>>, vector<1x4x256xf32>,
    return
  }
  func.func @transform_0(%arg0: i32, %arg1: i32) -> (i32, i32, i32) {
    %c0_i32 = arith.constant 0 : i32
    %c0_i32_0 = arith.constant 0 : i32
    return %arg0, %c0_i32, %arg1 : i32, i32, i32
  }
  func.func @transform_1(%arg0: i32, %arg1: i32) -> (i32, i32, i32) {
    %c0_i32 = arith.constant 0 : i32
    %c0_i32_0 = arith.constant 0 : i32
    return %arg0, %c0_i32, %arg1 : i32, i32, i32
  }
  func.func @transform_2(%arg0: i32, %arg1: i32) -> (i32, i32, i32) {
    %c0_i32 = arith.constant 0 : i32
    %c0_i32_0 = arith.constant 0 : i32
    return %arg0, %c0_i32, %arg1 : i32, i32, i32
  }
  func.func @transform_3(%arg0: i32, %arg1: i32) -> (i32, i32, i32) {
    %c0_i32 = arith.constant 0 : i32
    %c0_i32_0 = arith.constant 0 : i32
    return %arg0, %c0_i32, %arg1 : i32, i32, i32
  }
  func.func @transform_4(%arg0: i32, %arg1: i32) -> (i32, i32) {
    %c0_i32 = arith.constant 0 : i32
    %c0_i32_0 = arith.constant 0 : i32
    %c0_i32_1 = arith.constant 0 : i32
    return %c0_i32, %c0_i32_0 : i32, i32
  }
  func.func @transform_5(%arg0: i32, %arg1: i32) -> (i32, i32) {
    %c0_i32 = arith.constant 0 : i32
    %c0_i32_0 = arith.constant 0 : i32
    %c0_i32_1 = arith.constant 0 : i32
    return %c0_i32, %c0_i32_0 : i32, i32
  }
  func.func @transform_6(%arg0: i32, %arg1: i32) -> (i32, i32) {
    %c0_i32 = arith.constant 0 : i32
    %c0_i32_0 = arith.constant 0 : i32
    %c0_i32_1 = arith.constant 0 : i32
    return %c0_i32, %c0_i32_0 : i32, i32
  }
  func.func @transform_7(%arg0: i32, %arg1: i32) -> (i32, i32) {
    %c0_i32 = arith.constant 0 : i32
    %c0_i32_0 = arith.constant 0 : i32
    %c0_i32_1 = arith.constant 0 : i32
    return %c0_i32, %c0_i32_0 : i32, i32
  }
  func.func @transform_8(%arg0: i32, %arg1: i32) -> (i32, i32) {
    %c0_i32 = arith.constant 0 : i32
    %c0_i32_0 = arith.constant 0 : i32
    %c0_i32_1 = arith.constant 0 : i32
    return %c0_i32, %c0_i32_0 : i32, i32
  }
  func.func @transform_9(%arg0: i32, %arg1: i32) -> (i32, i32) {
    %c0_i32 = arith.constant 0 : i32
    %c0_i32_0 = arith.constant 0 : i32
    %c0_i32_1 = arith.constant 0 : i32
    return %c0_i32, %c0_i32_0 : i32, i32
  }
  func.func @transform_10(%arg0: i32, %arg1: i32) -> (i32, i32, i32) {
    %c0_i32 = arith.constant 0 : i32
    %c0_i32_0 = arith.constant 0 : i32
    return %arg0, %c0_i32, %arg1 : i32, i32, i32
  }
}

</mosaic_0001>

<bundles_post_ra>
// kernel: mstff3_forward.1
= control target key start
LH: loop header
LB: loop body
LE: loop exit
PB: predicated region body
PF: predicated region fallthrough
CT: control target
= control target key end

     0   :  { %s1448_s13 = smov 0   ;;  %s1450_s14 = smov 0   ;;  %s1554_s0 = inlined_call_operand.vmem [shape: f32[2,4,256], index: 0, kind: input, shape index: {}]   ;;  %s1555_s1 = inlined_call_operand.vmem [shape: f32[2,4,256], index: 1, kind: input, shape index: {}]   ;;  %s1556_s2 = inlined_call_operand.vmem [shape: f32[2,4,256], index: 2, kind: input, shape index: {}]   ;;  %s1557_s3 = inlined_call_operand.vmem [shape: f32[2,4,256], index: 3, kind: input, shape index: {}]   ;;  %s1558_s4 = inlined_call_operand.vmem [shape: f32[2,4], index: 4, kind: input, shape index: {}]   ;;  %s1559_s5 = inlined_call_operand.vmem [shape: f32[2,1], index: 5, kind: input, shape index: {}]   ;;  %s1560_s6 = inlined_call_operand.vmem [shape: f32[3,2], index: 6, kind: input, shape index: {}]   ;;  %s1561_s7 = inlined_call_operand.vmem [shape: f32[3,2], index: 7, kind: input, shape index: {}]   ;;  %s1562_s8 = inlined_call_operand.vmem [shape: f32[3,2], index: 8, kind: input, shape index: {}]   ;;  %s1563_s9 = inlined_call_operand.vmem [shape: f32[3,1], index: 9, kind: input, shape index: {}]   ;;  %s1564_s10 = inlined_call_operand.vmem [shape: f32[2,4,256], index: 10, kind: output, shape index: {}]  }
   0x1   :  { %s1452_s15 = smov 0  }
   0x2 LB: > { %s32_s16 = sadd.s32 1, %s1385_s14  ;;  %p1285_p0 = scmp.ge.s32.totalorder %s1389_s15, 1  ;;  %s1389_s15 = sphi %s1452_s15, %s20_s15   ;;  %s1385_s14 = sphi %s1450_s14, %s1566_s14   ;;  %s1381_s13 = sphi %s1448_s13, %s1565_s13  }
   0x3   : > { %p34_p1 = scmp.ge.s32.totalorder %s32_s16, 2  ;;  %p384_p2 = scmp.lt.s32.totalorder %s1389_s15, 3 }
   0x5   : > { %s1568_s16 = smov (%p34_p1, %s32_s16), 0  ;;  %p385_p3 = pnand %p1285_p0, %p384_p2 }
   0x6   : > { %p458_p4 = scmp.lt.s32.totalorder (!%p385_p3), %s1381_s13, 1 }
   0x7   : > { %388 = sbr.rel (%p385_p3) target bundleno = 495 (0x1ef), region = 60 }
   0xc   : > { %v1391_v0 = vmov 0.0   ;;  %v508_v1 = vld [vmem:[%s1559_s5] sm:$0x3]  ;;  %s1570_s13 = smov (!%p458_p4, %s1381_s13), 1  ;;  %v1392_v2 = vmov 0   ;;  %vm528_vm0 = vcmask 1043456  }
   0xd   : > { %597 = vmatprep.mubr.f32.mxu0 %v1391_v0  ;;  %676 = vmatprep.mubr.f32.mxu1 %v1391_v0  ;;  %s1471_s19 = sshll.u32 %s1570_s13, 3  ;;  %v512_v3 = vld [vmem:[%s1563_s9] sm:$0x7]  ;;  %vm524_vm1 = vcmask 31744   ;;  %vm768_vm2 = vcmask 1041408   ;;  %vm764_vm3 = vcmask 15360  }
   0xe   : > { %1347 = vset.pattern.permute.xlu0 %v1392_v2  ;;  %s475_s24 = scalar_lea.vmem %s1555_s1, %s1471_s19  ;;  %s485_s27 = scalar_lea.vmem %s1556_s2, %s1471_s19  ;;  %v507_v8 = vld [vmem:[%s1558_s4] sm:$0x3] }
   0xf   : > { %519 = vperm.xlu0 %1347, %v508_v1   ;;  %v1480_v4 = vld [vmem:[%s475_s24] sm:$0xff]  ;;  %s495_s30 = scalar_lea.vmem %s1557_s3, %s1471_s19  ;;  %s465_s25 = scalar_lea.vmem %s1554_s0, %s1471_s19 }
  0x10   : > { %v523_v5 = vcombine.high %v1480_v4, %v1480_v4  ;;  %v1488_v6 = vld [vmem:[%s485_s27] sm:$0xff]  ;;  %s505_s28 = scalar_lea.vmem %s1564_s10, %s1471_s19 }
  0x11   : > { %v607_v7 = vcombine.high %v1488_v6, %v1488_v6  ;;  %v1499_v9 = vld [vmem:[%s495_s30] sm:$0xff] }
  0x12   : > { %1296 = vmatprep.subr.msk.mxu0 %vm528_vm0, %v523_v5  ;;  %v686_v10 = vcombine.high %v1499_v9, %v1499_v9  ;;  %v509_v26 = vld [vmem:[%s1560_s6] sm:$0x7] }
  0x13   : > { %1010 = vperm.xlu0 %1347, %v512_v3   ;;  %1299 = vmatprep.subr.msk.mxu1 %vm528_vm0, %v607_v7  ;;  %v510_v29 = vld [vmem:[%s1561_s7] sm:$0x7] }
  0x14   : > { %1297 = vmatpush1.msk.msra.mxu0 %vm528_vm0, %v1480_v4  ;;  %1300 = vmatpush1.msk.msra.mxu1 %vm528_vm0, %v1488_v6  ;;  %v511_v32 = vld [vmem:[%s1562_s8] sm:$0x7] }
  0x15   : > { %1298 = vmatmul.mubr.msk.f32.vlgmr.msra.gmra.mxu0 %vm524_vm1, %v507_v8  ;;  %1301 = vmatmul.mubr.msk.f32.vlgmr.msra.gmra.mxu1 %vm524_vm1, %v507_v8 }
  0x16   : > { %1302 = vmatprep.subr.msk.mxu0 %vm528_vm0, %v686_v10  ;;  %755 = vmatprep.mubr.f32.mxu0 %v1391_v0 }
  0x17   : > { %1303 = vmatpush1.msk.msra.mxu0 %vm528_vm0, %v1499_v9  ;;  %839 = vmatprep.mubr.f32.mxu1 %v1391_v0 }
  0x19   : > { %1304 = vmatmul.mubr.msk.f32.vlgmr.msra.gmra.mxu0 %vm524_vm1, %v507_v8 }
  0x1a   : > { %919 = vmatprep.mubr.f32.mxu0 %v1391_v0 }
  0x8a   : > { %v520_v12 = vpop.permute.xlu0 %519 }
  0x8e   : > { %v1011_v41 = vpop.permute.xlu0 %1010 }
  0xd5   : > { %v599_v11 = vpop.f32.mrf.mxu0  ;;  %v678_v13 = vpop.f32.mrf.mxu1 }
  0xd6   : > { %v600_v14 = vadd.f32 %v599_v11, %v520_v12  ;;  %v679_v16 = vadd.f32 %v678_v13, %v520_v12 }
  0xd7   : > { %v601_v15 = vpop.f32.mrf.mxu0  ;;  %v680_v18 = vpop.f32.mrf.mxu1 }
  0xd8   : > { %v602_v17 = vadd.f32 %v601_v15, %v520_v12  ;;  %v681_v19 = vadd.f32 %v680_v18, %v520_v12  ;;  %v604_v22 = vmax.f32 %v600_v14, 0.0  ;;  %v683_v27 = vmax.f32 %v679_v16, 0.0 }
  0xd9   : > { %v757_v20 = vpop.f32.mrf.mxu0 }
  0xda   : > { %v605_v21 = vmax.f32 %v602_v17, 0.0  ;;  %v684_v23 = vmax.f32 %v681_v19, 0.0  ;;  %v758_v24 = vadd.f32 %v757_v20, %v520_v12 }
  0xdb   : > { %v759_v25 = vpop.f32.mrf.mxu0 }
  0xdc   : > { %v760_v28 = vadd.f32 %v759_v25, %v520_v12  ;;  %1308 = vmatprep.subr.msk.mxu0 %vm768_vm2, %v605_v21  ;;  %1305 = vmatprep.subr.msk.mxu1 %vm768_vm2, %v684_v23  ;;  %v762_v31 = vmax.f32 %v758_v24, 0.0  ;;  %v1097_v24 = vlaneseq }
  0xdd   : > { %1309 = vmatpush1.msk.msra.mxu0 %vm768_vm2, %v604_v22  ;;  %1306 = vmatpush1.msk.msra.mxu1 %vm768_vm2, %v683_v27 }
  0xde   : > { %v763_v30 = vmax.f32 %v760_v28, 0.0  ;;  %1310 = vmatmul.mubr.msk.f32.vlgmr.msra.gmra.mxu0 %vm764_vm3, %v509_v26  ;;  %1307 = vmatmul.mubr.msk.f32.vlgmr.msra.gmra.mxu1 %vm764_vm3, %v510_v29  ;;  %v1098_v28 = vshrl.u32 %v1097_v24, 7 }
  0xdf   : > { %999 = vmatprep.mubr.f32.mxu1 %v1391_v0 }
  0xe0   : > { %1311 = vmatprep.subr.msk.mxu1 %vm768_vm2, %v763_v30 }
  0xe1   : > { %1312 = vmatpush1.msk.msra.mxu1 %vm768_vm2, %v762_v31 }
  0xe2   : > { %1313 = vmatmul.mubr.msk.f32.vlgmr.msra.gmra.mxu1 %vm764_vm3, %v511_v32 }
 0x19e   : > { %v921_v33 = vpop.f32.mrf.mxu0  ;;  %v841_v34 = vpop.f32.mrf.mxu1 }
 0x19f   : > { %v922_v37 = vadd.f32 %v921_v33, %v841_v34 }
 0x1a0   : > { %v843_v35 = vpop.f32.mrf.mxu1  ;;  %v923_v36 = vpop.f32.mrf.mxu0 }
 0x1a1   : > { %v924_v39 = vadd.f32 %v923_v36, %v843_v35  ;;  %v1099_v35 = vsub.s32 0, %v1098_v28 }
 0x1a2   : > { %v1001_v38 = vpop.f32.mrf.mxu1 }
 0x1a3   : > { %v1006_v40 = vadd.f32 %v1001_v38, %v922_v37  ;;  %v1112_v38 = vsub.s32 1, %v1098_v28 }
 0x1a4   : > { %v1003_v42 = vpop.f32.mrf.mxu1 }
 0x1a5   : > { %v1013_v43 = vadd.f32 %v1011_v41, %v1006_v40  ;;  %v1007_v44 = vadd.f32 %v1003_v42, %v924_v39  ;;  %v1126_v39 = vsub.s32 2, %v1098_v28 }
 0x1a7   : > { %v1017_v45 = vrot.slane %v1013_v43, 1  ;;  %v1014_v46 = vadd.f32 %v1011_v41, %v1007_v44  ;;  %v1023_v48 = vrot.slane %v1013_v43, 2 }
 0x1a9   : > { %v1021_v47 = vmax.f32 %v1013_v43, %v1017_v45  ;;  %v1018_v49 = vrot.slane %v1014_v46, 1  ;;  %v1024_v52 = vrot.slane %v1014_v46, 2 }
 0x1ab   : > { %v1027_v50 = vmax.f32 %v1021_v47, %v1023_v48  ;;  %v1022_v51 = vmax.f32 %v1014_v46, %v1018_v49 }
 0x1ad   : > { %v1029_v53 = vsub.f32 %v1013_v43, %v1027_v50  ;;  %v1037_v54 = vrot.slane %v1027_v50, 7  ;;  %v1047_v55 = vrot.slane %v1027_v50, 6  ;;  %v1028_v56 = vmax.f32 %v1022_v51, %v1024_v52 }
 0x1af   : > { %v1041_v57 = vsub.f32 %v1013_v43, %v1037_v54  ;;  %v1051_v58 = vsub.f32 %v1013_v43, %v1047_v55  ;;  %v1030_v59 = vsub.f32 %v1014_v46, %v1028_v56  ;;  %v1038_v60 = vrot.slane %v1028_v56, 7 }
 0x1b0   : > { %v1048_v61 = vrot.slane %v1028_v56, 6  ;;  %v1031_v62 = vmul.f32 1.442695, %v1029_v53 }
 0x1b1   : > { %v1043_v63 = vmul.f32 1.442695, %v1041_v57  ;;  %v1053_v0 = vmul.f32 1.442695, %v1051_v58  ;;  %v1042_v1 = vsub.f32 %v1014_v46, %v1038_v60  ;;  %v1033_v3 = vmul.f32 1.442695, %v1030_v59 }
 0x1b2   : > { %v1052_v2 = vsub.f32 %v1014_v46, %v1048_v61  ;;  %v513_v59 = vld [vmem:[%s465_s25] sm:$0xff] }
 0x1b3   : > { %1351 = vpow2.f32 %v1043_v63  ;;  %v1045_v5 = vmul.f32 1.442695, %v1042_v1 }
 0x1b4   : > { %1353 = vpow2.f32 %v1053_v0  ;;  %v1055_v7 = vmul.f32 1.442695, %v1052_v2 }
 0x1b5   : > { %1355 = vpow2.f32 %v1031_v62 }
 0x1b6   : > { %1357 = vpow2.f32 %v1045_v5 }
 0x1b7   : > { %1359 = vpow2.f32 %v1055_v7 }
 0x1b8   : > { %1361 = vpow2.f32 %v1033_v3 }
 0x1c0   : > { %v1352_v8 = vpop.eup %1351 }
 0x1c1   : > { %v1354_v10 = vpop.eup %1353  ;;  %v1059_v11 = vrot.slane %v1352_v8, 1 }
 0x1c2   : > { %v1356_v12 = vpop.eup %1355  ;;  %v1067_v15 = vrot.slane %v1354_v10, 2 }
 0x1c3   : > { %v1358_v13 = vpop.eup %1357  ;;  %v1063_v14 = vadd.f32 %v1356_v12, %v1059_v11 }
 0x1c4   : > { %v1360_v16 = vpop.eup %1359  ;;  %v1060_v17 = vrot.slane %v1358_v13, 1 }
 0x1c5   : > { %v1362_v18 = vpop.eup %1361  ;;  %v1071_v19 = vadd.f32 %v1067_v15, %v1063_v14  ;;  %v1068_v21 = vrot.slane %v1360_v16, 2 }
 0x1c6   : > { %v1064_v20 = vadd.f32 %v1362_v18, %v1060_v17 }
 0x1c7   : > { %1363 = vrcp.f32 %v1071_v19 }
 0x1c8   : > { %v1072_v22 = vadd.f32 %v1068_v21, %v1064_v20 }
 0x1ca   : > { %1365 = vrcp.f32 %v1072_v22 }
 0x1d4   : > { %v1364_v23 = vpop.eup %1363 }
 0x1d5   : > { %v1075_v25 = vmul.f32 %v1364_v23, %v1071_v19 }
 0x1d7   : > { %v1366_v26 = vpop.eup %1365  ;;  %v1077_v27 = vsub.f32 2.0, %v1075_v25 }
 0x1d8   : > { %v1076_v29 = vmul.f32 %v1366_v26, %v1072_v22 }
 0x1d9   : > { %v1079_v30 = vmul.f32 %v1364_v23, %v1077_v27 }
 0x1da   : > { %v1078_v31 = vsub.f32 2.0, %v1076_v29 }
 0x1db   : > { %v1085_v32 = vrot.slane %v1079_v30, 7  ;;  %v1091_v33 = vrot.slane %v1079_v30, 6  ;;  %v1081_v34 = vmul.f32 %v1356_v12, %v1079_v30 }
 0x1dc   : > { %v1080_v36 = vmul.f32 %v1366_v26, %v1078_v31 }
 0x1dd   : > { %v1089_v37 = vmul.f32 %v1352_v8, %v1085_v32  ;;  %v1095_v40 = vmul.f32 %v1354_v10, %v1091_v33  ;;  %v1100_v44 = vrot.slane %v1081_v34, %v1099_v35 }
 0x1de   : > { %v1082_v41 = vmul.f32 %v1362_v18, %v1080_v36  ;;  %v1086_v42 = vrot.slane %v1080_v36, 7  ;;  %v1092_v43 = vrot.slane %v1080_v36, 6 }
 0x1df   : > { %v1113_v48 = vrot.slane %v1089_v37, %v1112_v38  ;;  %v1127_v49 = vrot.slane %v1095_v40, %v1126_v39 }
 0x1e0   : > { %v1090_v45 = vmul.f32 %v1358_v13, %v1086_v42  ;;  %v1096_v46 = vmul.f32 %v1360_v16, %v1092_v43  ;;  %v1104_v47 = vrot.slane %v1082_v41, %v1099_v35 }
 0x1e2   : > { %v1107_v50 = vcombine.low %v1100_v44, %v1104_v47  ;;  %v1117_v51 = vrot.slane %v1090_v45, %v1112_v38  ;;  %v1131_v52 = vrot.slane %v1096_v46, %v1126_v39 }
 0x1e4   : > { %v1120_v53 = vcombine.low %v1113_v48, %v1117_v51  ;;  %v1134_v54 = vcombine.low %v1127_v49, %v1131_v52  ;;  %v1109_v55 = vmul.f32 %v1107_v50, %v1480_v4 }
 0x1e6   : > { %v1122_v56 = vmul.f32 %v1120_v53, %v1488_v6  ;;  %v1136_v58 = vmul.f32 %v1134_v54, %v1499_v9 }
 0x1e8   : > { %v1123_v57 = vadd.f32 %v1122_v56, %v1109_v55 }
 0x1ea   : > { %v1137_v60 = vadd.f32 %v1136_v58, %v1123_v57 }
 0x1ec   : > { %v1138_v61 = vadd.f32 %v1137_v60, %v513_v59 }
 0x1ee   : > { %1139 = vst [vmem:[%s505_s28] sm:$0xff] %v1138_v61 }
 0x1ef PF: > { %s20_s15 = sadd.s32 1, %s1389_s15   ;;  %s1565_s13 = smov %s1385_s14 }
 0x1f0   : > { %p17_p5 = scmp.ge.s32.totalorder %s20_s15, 4   ;;  %s1566_s14 = smov %s1568_s16 }
 0x1f2   :  { %19 = sbr.rel (!%p17_p5) target bundleno = 2 (0x2), region = 99 }

</bundles_post_ra>
